<compile_context>
chip_gen: v6e
topology: v6e:2x2x1
jax: 0.10.0
libtpu: 0.0.40
codegen_flags: <defaults>
</compile_context>

<pallas_src>
import functools

import jax
import jax.numpy as jnp
from jax import lax
from jax.experimental import pallas as pl
from jax.experimental.pallas import tpu as pltpu


def _round_up(x, m):
    return -(-x // m) * m


def conv_adapter_kernel(x_main_ref, x_halo_ref, w_ref, b_ref, o_ref, *,
                        kh, kw, wq, tile_h):
    """One grid step = one (batch, row-tile).

    x_main_ref: (1, Cin, tile_h*Wq)    padded rows [t*tile_h, (t+1)*tile_h), flattened
    x_halo_ref: (1, Cin, 2*Wq)         the 2 halo rows [(t+1)*tile_h, (t+1)*tile_h+2)
    w_ref     : (KH*KW, Cout_pad, Cin) folded conv1∘conv2∘se weights, k = di*KW+dj
    b_ref     : (Cout_pad, 1)          folded bias (f32)
    o_ref     : (1, Cout_pad, tile_h*Wq) lane-dense flat output tile
    """
    lout = tile_h * wq

    xm = x_main_ref[0]                                   # (Cin, tile_h*Wq)
    xh = x_halo_ref[0]                                   # (Cin, 2*Wq)
    # 2-row-halo slab (both pieces are 128-lane aligned, so this is a cheap
    # aligned copy).
    # TODO(synk): a single overlapping-window input spec (pl.Element-style
    # index map) would remove this one remaining slab copy entirely.
    slab = jnp.concatenate([xm, xh], axis=1)             # (Cin, (tile_h+2)*Wq)

    # Hoist the dj (column) shifts: build the 1- and 2-lane shifted slabs once
    # and reuse them for all three di, so only (kw-1) cross-lane relayouts are
    # paid instead of kh*(kw-1) unaligned tap slices.  The wrapped leading
    # lanes land only in discarded (col >= W) output columns.
    slabs = [slab]
    for dj in range(1, kw):
        slabs.append(jnp.concatenate([slab[:, dj:], slab[:, :dj]], axis=1))

    # 9-tap accumulation in f32 (no im2col stack).  Every tap slice start
    # di*Wq is a static multiple of 128 (Wq % 128 == 0) -> aligned lane slice.
    y = None
    for di in range(kh):
        base = di * wq
        for dj in range(kw):
            tap = slabs[dj][:, base:base + lout]         # (Cin, Lout)
            part = jnp.dot(w_ref[di * kw + dj], tap,
                           preferred_element_type=jnp.float32)
            y = part if y is None else y + part

    # Bias add in f32 (v5e has no bf16 VPU); store is lane-dense & unmasked.
    o_ref[0] = (y + b_ref[...]).astype(o_ref.dtype)


def _pick_tile_h(H, N, Cin, cout_pad, Wq, in_bytes, out_bytes, budget_bytes):
    """Largest row-tile (multiple of 8, divisor of H) whose per-step VMEM
    footprint fits the budget.  Footprint per padded row ~= double-buffered
    input + slab + 2 shifted slabs + double-buffered output + f32 accumulator."""
    per_row = Wq * (Cin * in_bytes * (2 + 3) + cout_pad * (2 * out_bytes + 4))
    cands = [d for d in range(8, H + 1, 8) if H % d == 0]
    if N == 1:  # keep >= 2 grid steps so both v7x TensorCores get work
        cands = [d for d in cands if H // d >= 2] or [8]
    tile_h = 8
    for d in cands:
        if (d + 2) * per_row <= budget_bytes:
            tile_h = d
    return tile_h, per_row


@functools.partial(jax.jit,
                   static_argnames=("tile_h", "compute_dtype",
                                    "vmem_budget_bytes"))
def conv_adapter_forward(x_nchw, w1_oihw, b1, w2_oihw, b2, se, *,
                         tile_h=None, compute_dtype=jnp.bfloat16,
                         vmem_budget_bytes=20 * 1024 * 1024):
    """Matches ConvAdapter.forward for the default config. Input/output NCHW."""
    N, Cin, H, W = x_nchw.shape
    width, cin_w, KH, KW = w1_oihw.shape
    Cout = w2_oihw.shape[0]
    out_dtype = x_nchw.dtype

    # Default config only (stride=1, groups=1, dilation=1, padding=1).
    # NOTE: the conv2/bias2/se fold below is valid ONLY because act/norm are
    # Identity in this configuration.
    assert cin_w == Cin and (KH, KW) == (3, 3), "kernel supports the default 3x3 config"
    assert w2_oihw.shape[1:] == (width, 1, 1)
    assert H % 8 == 0, "Pallas path requires H % 8 == 0"  # TODO(synk): pad H otherwise

    pad = 1
    # Lane-align the padded width to 128 so all di*Wq tap offsets are aligned.
    Wq = _round_up(W + 2 * pad, 128)
    assert Wq >= W + 2  # row-wrap of the dj shifts only touches discarded cols
    Hp = H + 2 * pad

    in_bytes = jnp.dtype(compute_dtype).itemsize
    out_bytes = jnp.dtype(out_dtype).itemsize
    # Pad Cout to a full sublane multiple -> unmasked output stores.
    cout_pad = _round_up(Cout, 16 if out_bytes == 2 else 8)

    if tile_h is None:
        tile_h, per_row = _pick_tile_h(H, N, Cin, cout_pad, Wq,
                                       in_bytes, out_bytes, vmem_budget_bytes)
    else:
        _, per_row = _pick_tile_h(H, N, Cin, cout_pad, Wq,
                                  in_bytes, out_bytes, vmem_budget_bytes)
    assert H % tile_h == 0 and tile_h % 8 == 0

    T = H // tile_h
    lout = tile_h * Wq
    est_bytes = (tile_h + 2) * per_row + 4 * Cin * 2 * Wq * in_bytes \
        + 2 * (KH * KW * cout_pad * Cin * in_bytes + cout_pad * 4)
    vmem_limit = int(min(48 * 1024 * 1024, max(2 * est_bytes, 24 * 1024 * 1024)))

    # ---- fold conv2 + bias2 + se into conv1 (f32, highest precision) ----
    hi = lax.Precision.HIGHEST
    w2m = w2_oihw[:, :, 0, 0]                                      # (Cout, width)
    se_v = se.reshape(Cout)
    wc = jnp.einsum("ow,wikl->oikl", w2m, w1_oihw, precision=hi)   # (Cout,Cin,KH,KW)
    wc = wc * se_v[:, None, None, None]
    bc = (jnp.dot(w2m, b1, precision=hi) + b2) * se_v              # (Cout,)
    wc = jnp.pad(wc, ((0, cout_pad - Cout), (0, 0), (0, 0), (0, 0)))
    bc = jnp.pad(bc, (0, cout_pad - Cout))
    # (KH*KW, Cout_pad, Cin), k = di*KW + dj; weights DMA'd in compute dtype.
    w_tap = jnp.transpose(wc, (2, 3, 0, 1)).reshape(KH * KW, cout_pad, Cin)
    w_tap = w_tap.astype(compute_dtype)
    b_col = bc.reshape(cout_pad, 1).astype(jnp.float32)

    # ---- boundary cast + spatial pad (halo + lane alignment), stays NCHW ----
    # The bf16 cast is fused into the pad pass, so the pad writes half the
    # bytes it used to.
    # TODO(synk): generating the zero halo / zero columns inside the kernel
    # (pl.when on t==0 / t==T-1 + a column iota mask) would remove this extra
    # HBM pass over the input entirely.
    x_c = x_nchw.astype(compute_dtype)
    x_pad = jnp.pad(x_c, ((0, 0), (0, 0), (pad, pad), (pad, Wq - W - pad)))
    x_flat = x_pad.reshape(N, Cin, Hp * Wq)

    out_flat = pl.pallas_call(
        functools.partial(conv_adapter_kernel, kh=KH, kw=KW, wq=Wq,
                          tile_h=tile_h),
        out_shape=jax.ShapeDtypeStruct((N, cout_pad, H * Wq), out_dtype),
        grid_spec=pltpu.PrefetchScalarGridSpec(
            num_scalar_prefetch=0,
            grid=(N, T),
            in_specs=[
                # main rows of the tile (block index along the flat axis)
                pl.BlockSpec((1, Cin, lout), lambda n, t: (n, 0, t)),
                # 2-row halo = rows [(t+1)*tile_h, (t+1)*tile_h + 2); always
                # fully in-bounds since the padded image has H+2 rows.
                pl.BlockSpec((1, Cin, 2 * Wq),
                             lambda n, t: (n, 0, (t + 1) * (tile_h // 2))),
                # folded weights / bias: constant block index -> stay resident.
                # TODO(synk): pipeline_mode=pl.Buffered(1) would drop their
                # second buffer (a few MiB for very large adapters on v7x).
                pl.BlockSpec((KH * KW, cout_pad, Cin), lambda n, t: (0, 0, 0)),
                pl.BlockSpec((cout_pad, 1), lambda n, t: (0, 0)),
            ],
            out_specs=pl.BlockSpec((1, cout_pad, lout), lambda n, t: (n, 0, t)),
        ),
        compiler_params=pltpu.CompilerParams(
            dimension_semantics=("parallel", "parallel"),
            vmem_limit_bytes=vmem_limit),
    )(x_flat, x_flat, w_tap, b_col)

    # Contiguous (free) reshape; drop the Cout / lane padding in the wrapper
    # (keeps the in-kernel stores unmasked; this slice usually fuses into the
    # consumer).
    out = out_flat.reshape(N, cout_pad, H, Wq)[:, :Cout, :, :W]
    return out


def reference_forward(x_nchw, w1_oihw, b1, w2_oihw, b2, se):
    """Pure-JAX reference mirroring the PyTorch module (NCHW conv semantics)."""
    dn = ("NCHW", "OIHW", "NCHW")
    hi = lax.Precision.HIGHEST
    out = lax.conv_general_dilated(
        x_nchw, w1_oihw, window_strides=(1, 1), padding=((1, 1), (1, 1)),
        dimension_numbers=dn, precision=hi)
    out = out + b1.reshape(1, -1, 1, 1)
    # act = Identity
    out = lax.conv_general_dilated(
        out, w2_oihw, window_strides=(1, 1), padding=((0, 0), (0, 0)),
        dimension_numbers=dn, precision=hi)
    out = out + b2.reshape(1, -1, 1, 1)
    out = out * se
    return out


if __name__ == "__main__":
    # ConvAdapter(inplanes=4, outplanes=4, width=8, kernel_size=3, padding=1)
    N, Cin, H, W = 2, 4, 16, 16
    width, Cout, K = 8, 4, 3

    key = jax.random.PRNGKey(0)
    kx, kw1, kb1, kw2, kb2, kse = jax.random.split(key, 6)

    x = jax.random.normal(kx, (N, Cin, H, W), dtype=jnp.float32)

    # Deterministic parameter init (shapes per nn.Conv2d; values synthetic).
    w1 = jax.random.normal(kw1, (width, Cin, K, K), dtype=jnp.float32) * 0.1
    b1 = jax.random.normal(kb1, (width,), dtype=jnp.float32) * 0.1
    w2 = jax.random.normal(kw2, (Cout, width, 1, 1), dtype=jnp.float32) * 0.1
    b2 = jax.random.normal(kb2, (Cout,), dtype=jnp.float32) * 0.1
    # The module initializes se to ones; perturb it so the se-fold is exercised.
    se = 1.0 + 0.1 * jax.random.normal(kse, (1, Cout, 1, 1), dtype=jnp.float32)

    # tile_h=8 -> grid (N, 2): exercises the multi-row-tile + 2-row-halo path.
    out = conv_adapter_forward(x, w1, b1, w2, b2, se, tile_h=8)
    out = jax.block_until_ready(out)

    ref = reference_forward(x, w1, b1, w2, b2, se)
    assert out.shape == (N, Cout, H, W), out.shape
    max_err = float(jnp.max(jnp.abs(out - ref)))
    # tolerance covers the bf16 boundary cast of activations / folded weights
    assert max_err < 2e-2, max_err

    print("KERNEL_OK")
</pallas_src>

<mosaic_0001>
module attributes {stable_mosaic.version = 11 : i64} {
  func.func @conv_adapter_kernel(%arg0: i32, %arg1: i32, %arg2: memref<1x4x1024xbf16, #tpu.memory_space<vmem>>, %arg3: memref<1x4x256xbf16, #tpu.memory_space<vmem>>, %arg4: memref<9x8x4xbf16, #tpu.memory_space<vmem>>, %arg5: memref<8x1xf32, #tpu.memory_space<vmem>>, %arg6: memref<1x8x1024xf32, #tpu.memory_space<vmem>>) attributes {dimension_semantics = [#tpu.dimension_semantics<parallel>, #tpu.dimension_semantics<parallel>], iteration_bounds = array<i64: 2, 2>, scalar_prefetch = 0 : i64, scratch_operands = 0 : i64, tpu.core_type = #tpu.core_type<tc>, window_params = [{transform_indices = @transform_0, window_bounds = array<i64: 1, 4, 1024>}, {transform_indices = @transform_1, window_bounds = array<i64: 1, 4, 256>}, {pipeline_mode = #tpu.pipeline_mode<synchronous>, transform_indices = @transform_2, window_bounds = array<i64: 9, 8, 4>}, {pipeline_mode = #tpu.pipeline_mode<synchronous>, transform_indices = @transform_3, window_bounds = array<i64: 8, 1>}, {transform_indices = @transform_4, window_bounds = array<i64: 1, 8, 1024>}]} {
    %c0 = arith.constant 0 : index
    %c0_0 = arith.constant 0 : index
    %c0_1 = arith.constant 0 : index
    %0 = vector.load %arg2[%c0, %c0_0, %c0_1] : memref<1x4x1024xbf16, #tpu.memory_space<vmem>>, vector<1x4x1024xbf16>
    %1 = vector.shape_cast %0 : vector<1x4x1024xbf16> to vector<4x1024xbf16>
    %c0_2 = arith.constant 0 : index
    %c0_3 = arith.constant 0 : index
    %c0_4 = arith.constant 0 : index
    %2 = vector.load %arg3[%c0_2, %c0_3, %c0_4] : memref<1x4x256xbf16, #tpu.memory_space<vmem>>, vector<1x4x256xbf16>
    %3 = vector.shape_cast %2 : vector<1x4x256xbf16> to vector<4x256xbf16>
    %4 = tpu.concatenate %1, %3 in 1 : vector<4x1024xbf16>, vector<4x256xbf16> -> vector<4x1280xbf16>
    %5 = vector.extract_strided_slice %4 {offsets = [0, 1], sizes = [4, 1279], strides = [1, 1]} : vector<4x1280xbf16> to vector<4x1279xbf16>
    %6 = vector.extract_strided_slice %4 {offsets = [0, 0], sizes = [4, 1], strides = [1, 1]} : vector<4x1280xbf16> to vector<4x1xbf16>
    %7 = tpu.concatenate %5, %6 in 1 : vector<4x1279xbf16>, vector<4x1xbf16> -> vector<4x1280xbf16>
    %8 = vector.extract_strided_slice %4 {offsets = [0, 2], sizes = [4, 1278], strides = [1, 1]} : vector<4x1280xbf16> to vector<4x1278xbf16>
    %9 = vector.extract_strided_slice %4 {offsets = [0, 0], sizes = [4, 2], strides = [1, 1]} : vector<4x1280xbf16> to vector<4x2xbf16>
    %10 = tpu.concatenate %8, %9 in 1 : vector<4x1278xbf16>, vector<4x2xbf16> -> vector<4x1280xbf16>
    %11 = vector.extract_strided_slice %4 {offsets = [0, 0], sizes = [4, 1024], strides = [1, 1]} : vector<4x1280xbf16> to vector<4x1024xbf16>
    %c0_5 = arith.constant 0 : index
    %c0_6 = arith.constant 0 : index
    %c0_7 = arith.constant 0 : index
    %12 = vector.load %arg4[%c0_5, %c0_6, %c0_7] : memref<9x8x4xbf16, #tpu.memory_space<vmem>>, vector<1x8x4xbf16>
    %13 = vector.shape_cast %12 : vector<1x8x4xbf16> to vector<8x4xbf16>
    %cst = arith.constant dense<0.000000e+00> : vector<8x1024xf32>
    %14 = tpu.matmul %13, %11, %cst {dimension_numbers = #tpu.dot_dimension_numbers<[1], [0], [0], [1], [0, 0, 1, 1], [], []>} : vector<8x4xbf16>, vector<4x1024xbf16>, vector<8x1024xf32> -> vector<8x1024xf32>
    %15 = vector.extract_strided_slice %7 {offsets = [0, 0], sizes = [4, 1024], strides = [1, 1]} : vector<4x1280xbf16> to vector<4x1024xbf16>
    %c1 = arith.constant 1 : index
    %c0_8 = arith.constant 0 : index
    %c0_9 = arith.constant 0 : index
    %16 = vector.load %arg4[%c1, %c0_8, %c0_9] : memref<9x8x4xbf16, #tpu.memory_space<vmem>>, vector<1x8x4xbf16>
    %17 = vector.shape_cast %16 : vector<1x8x4xbf16> to vector<8x4xbf16>
    %cst_10 = arith.constant dense<0.000000e+00> : vector<8x1024xf32>
    %18 = tpu.matmul %17, %15, %cst_10 {dimension_numbers = #tpu.dot_dimension_numbers<[1], [0], [0], [1], [0, 0, 1, 1], [], []>} : vector<8x4xbf16>, vector<4x1024xbf16>, vector<8x1024xf32> -> vector<8x1024xf32>
    %19 = arith.addf %14, %18 : vector<8x1024xf32>
    %20 = vector.extract_strided_slice %10 {offsets = [0, 0], sizes = [4, 1024], strides = [1, 1]} : vector<4x1280xbf16> to vector<4x1024xbf16>
    %c2 = arith.constant 2 : index
    %c0_11 = arith.constant 0 : index
    %c0_12 = arith.constant 0 : index
    %21 = vector.load %arg4[%c2, %c0_11, %c0_12] : memref<9x8x4xbf16, #tpu.memory_space<vmem>>, vector<1x8x4xbf16>
    %22 = vector.shape_cast %21 : vector<1x8x4xbf16> to vector<8x4xbf16>
    %cst_13 = arith.constant dense<0.000000e+00> : vector<8x1024xf32>
    %23 = tpu.matmul %22, %20, %cst_13 {dimension_numbers = #tpu.dot_dimension_numbers<[1], [0], [0], [1], [0, 0, 1, 1], [], []>} : vector<8x4xbf16>, vector<4x1024xbf16>, vector<8x1024xf32> -> vector<8x1024xf32>
    %24 = arith.addf %19, %23 : vector<8x1024xf32>
    %25 = vector.extract_strided_slice %4 {offsets = [0, 128], sizes = [4, 1024], strides = [1, 1]} : vector<4x1280xbf16> to vector<4x1024xbf16>
    %c3 = arith.constant 3 : index
    %c0_14 = arith.constant 0 : index
    %c0_15 = arith.constant 0 : index
    %26 = vector.load %arg4[%c3, %c0_14, %c0_15] : memref<9x8x4xbf16, #tpu.memory_space<vmem>>, vector<1x8x4xbf16>
    %27 = vector.shape_cast %26 : vector<1x8x4xbf16> to vector<8x4xbf16>
    %cst_16 = arith.constant dense<0.000000e+00> : vector<8x1024xf32>
    %28 = tpu.matmul %27, %25, %cst_16 {dimension_numbers = #tpu.dot_dimension_numbers<[1], [0], [0], [1], [0, 0, 1, 1], [], []>} : vector<8x4xbf16>, vector<4x1024xbf16>, vector<8x1024xf32> -> vector<8x1024xf32>
    %29 = arith.addf %24, %28 : vector<8x1024xf32>
    %30 = vector.extract_strided_slice %7 {offsets = [0, 128], sizes = [4, 1024], strides = [1, 1]} : vector<4x1280xbf16> to vector<4x1024xbf16>
    %c4 = arith.constant 4 : index
    %c0_17 = arith.constant 0 : index
    %c0_18 = arith.constant 0 : index
    %31 = vector.load %arg4[%c4, %c0_17, %c0_18] : memref<9x8x4xbf16, #tpu.memory_space<vmem>>, vector<1x8x4xbf16>
    %32 = vector.shape_cast %31 : vector<1x8x4xbf16> to vector<8x4xbf16>
    %cst_19 = arith.constant dense<0.000000e+00> : vector<8x1024xf32>
    %33 = tpu.matmul %32, %30, %cst_19 {dimension_numbers = #tpu.dot_dimension_numbers<[1], [0], [0], [1], [0, 0, 1, 1], [], []>} : vector<8x4xbf16>, vector<4x1024xbf16>, vector<8x1024xf32> -> vector<8x1024xf32>
    %34 = arith.addf %29, %33 : vector<8x1024xf32>
    %35 = vector.extract_strided_slice %10 {offsets = [0, 128], sizes = [4, 1024], strides = [1, 1]} : vector<4x1280xbf16> to vector<4x1024xbf16>
    %c5 = arith.constant 5 : index
    %c0_20 = arith.constant 0 : index
    %c0_21 = arith.constant 0 : index
    %36 = vector.load %arg4[%c5, %c0_20, %c0_21] : memref<9x8x4xbf16, #tpu.memory_space<vmem>>, vector<1x8x4xbf16>
    %37 = vector.shape_cast %36 : vector<1x8x4xbf16> to vector<8x4xbf16>
    %cst_22 = arith.constant dense<0.000000e+00> : vector<8x1024xf32>
    %38 = tpu.matmul %37, %35, %cst_22 {dimension_numbers = #tpu.dot_dimension_numbers<[1], [0], [0], [1], [0, 0, 1, 1], [], []>} : vector<8x4xbf16>, vector<4x1024xbf16>, vector<8x1024xf32> -> vector<8x1024xf32>
    %39 = arith.addf %34, %38 : vector<8x1024xf32>
    %40 = vector.extract_strided_slice %4 {offsets = [0, 256], sizes = [4, 1024], strides = [1, 1]} : vector<4x1280xbf16> to vector<4x1024xbf16>
    %c6 = arith.constant 6 : index
    %c0_23 = arith.constant 0 : index
    %c0_24 = arith.constant 0 : index
    %41 = vector.load %arg4[%c6, %c0_23, %c0_24] : memref<9x8x4xbf16, #tpu.memory_space<vmem>>, vector<1x8x4xbf16>
    %42 = vector.shape_cast %41 : vector<1x8x4xbf16> to vector<8x4xbf16>
    %cst_25 = arith.constant dense<0.000000e+00> : vector<8x1024xf32>
    %43 = tpu.matmul %42, %40, %cst_25 {dimension_numbers = #tpu.dot_dimension_numbers<[1], [0], [0], [1], [0, 0, 1, 1], [], []>} : vector<8x4xbf16>, vector<4x1024xbf16>, vector<8x1024xf32> -> vector<8x1024xf32>
    %44 = arith.addf %39, %43 : vector<8x1024xf32>
    %45 = vector.extract_strided_slice %7 {offsets = [0, 256], sizes = [4, 1024], strides = [1, 1]} : vector<4x1280xbf16> to vector<4x1024xbf16>
    %c7 = arith.constant 7 : index
    %c0_26 = arith.constant 0 : index
    %c0_27 = arith.constant 0 : index
    %46 = vector.load %arg4[%c7, %c0_26, %c0_27] : memref<9x8x4xbf16, #tpu.memory_space<vmem>>, vector<1x8x4xbf16>
    %47 = vector.shape_cast %46 : vector<1x8x4xbf16> to vector<8x4xbf16>
    %cst_28 = arith.constant dense<0.000000e+00> : vector<8x1024xf32>
    %48 = tpu.matmul %47, %45, %cst_28 {dimension_numbers = #tpu.dot_dimension_numbers<[1], [0], [0], [1], [0, 0, 1, 1], [], []>} : vector<8x4xbf16>, vector<4x1024xbf16>, vector<8x1024xf32> -> vector<8x1024xf32>
    %49 = arith.addf %44, %48 : vector<8x1024xf32>
    %50 = vector.extract_strided_slice %10 {offsets = [0, 256], sizes = [4, 1024], strides = [1, 1]} : vector<4x1280xbf16> to vector<4x1024xbf16>
    %c8 = arith.constant 8 : index
    %c0_29 = arith.constant 0 : index
    %c0_30 = arith.constant 0 : index
    %51 = vector.load %arg4[%c8, %c0_29, %c0_30] : memref<9x8x4xbf16, #tpu.memory_space<vmem>>, vector<1x8x4xbf16>
    %52 = vector.shape_cast %51 : vector<1x8x4xbf16> to vector<8x4xbf16>
    %cst_31 = arith.constant dense<0.000000e+00> : vector<8x1024xf32>
    %53 = tpu.matmul %52, %50, %cst_31 {dimension_numbers = #tpu.dot_dimension_numbers<[1], [0], [0], [1], [0, 0, 1, 1], [], []>} : vector<8x4xbf16>, vector<4x1024xbf16>, vector<8x1024xf32> -> vector<8x1024xf32>
    %54 = arith.addf %49, %53 : vector<8x1024xf32>
    %c0_32 = arith.constant 0 : index
    %c0_33 = arith.constant 0 : index
    %55 = vector.load %arg5[%c0_32, %c0_33] : memref<8x1xf32, #tpu.memory_space<vmem>>, vector<8x1xf32>
    %56 = vector.broadcast %55 : vector<8x1xf32> to vector<8x1024xf32>
    %57 = arith.addf %54, %56 : vector<8x1024xf32>
    %c0_34 = arith.constant 0 : index
    %c0_35 = arith.constant 0 : index
    %c0_36 = arith.constant 0 : index
    %58 = vector.load %arg6[%c0_34, %c0_35, %c0_36] : memref<1x8x1024xf32, #tpu.memory_space<vmem>>, vector<1x8x1024xf32>
    %59 = vector.shape_cast %58 : vector<1x8x1024xf32> to vector<8x1024xf32>
    %60 = vector.shape_cast %57 : vector<8x1024xf32> to vector<1x8x1024xf32>
    tpu.vector_store %arg6[%c0_34, %c0_35, %c0_36], %60 {strides = array<i32>} : memref<1x8x1024xf32, #tpu.memory_space<vmem>>, vector<1x8x1024xf32>,
    return
  }
  func.func @transform_0(%arg0: i32, %arg1: i32) -> (i32, i32, i32) {
    %c0_i32 = arith.constant 0 : i32
    %c0_i32_0 = arith.constant 0 : i32
    return %arg0, %c0_i32, %arg1 : i32, i32, i32
  }
  func.func @transform_1(%arg0: i32, %arg1: i32) -> (i32, i32, i32) {
    %c1_i32 = arith.constant 1 : i32
    %0 = arith.addi %arg1, %c1_i32 : i32
    %c4_i32 = arith.constant 4 : i32
    %1 = arith.muli %0, %c4_i32 : i32
    %c0_i32 = arith.constant 0 : i32
    %c0_i32_0 = arith.constant 0 : i32
    return %arg0, %c0_i32, %1 : i32, i32, i32
  }
  func.func @transform_2(%arg0: i32, %arg1: i32) -> (i32, i32, i32) {
    %c0_i32 = arith.constant 0 : i32
    %c0_i32_0 = arith.constant 0 : i32
    %c0_i32_1 = arith.constant 0 : i32
    %c0_i32_2 = arith.constant 0 : i32
    return %c0_i32, %c0_i32_0, %c0_i32_1 : i32, i32, i32
  }
  func.func @transform_3(%arg0: i32, %arg1: i32) -> (i32, i32) {
    %c0_i32 = arith.constant 0 : i32
    %c0_i32_0 = arith.constant 0 : i32
    %c0_i32_1 = arith.constant 0 : i32
    return %c0_i32, %c0_i32_0 : i32, i32
  }
  func.func @transform_4(%arg0: i32, %arg1: i32) -> (i32, i32, i32) {
    %c0_i32 = arith.constant 0 : i32
    %c0_i32_0 = arith.constant 0 : i32
    return %arg0, %c0_i32, %arg1 : i32, i32, i32
  }
}

</mosaic_0001>

<bundles_post_ra>
// kernel: conv_adapter_forward.1
= control target key start
LH: loop header
LB: loop body
LE: loop exit
PB: predicated region body
PF: predicated region fallthrough
CT: control target
= control target key end

     0   :  { %s2444_s15 = smov 0   ;;  %s2446_s16 = smov 0   ;;  %s2973_s0 = inlined_call_operand.vmem [shape: bf16[2,4,2304], index: 0, kind: input, shape index: {}, may-alias: {0,1}]   ;;  %s2974_s1 = inlined_call_operand.vmem [shape: bf16[2,4,2304], index: 1, kind: input, shape index: {}, may-alias: {0,1}]   ;;  %s2975_s2 = inlined_call_operand.vmem [shape: bf16[9,8,4], index: 2, kind: input, shape index: {}]   ;;  %s2976_s3 = inlined_call_operand.vmem [shape: f32[8,1], index: 3, kind: input, shape index: {}]   ;;  %s2977_s4 = inlined_call_operand.vmem [shape: f32[2,8,2048], index: 4, kind: output, shape index: {}]  }
   0x1   :  { %s2448_s17 = smov 0   ;;  %s2450_s18 = smov 0  }
   0x2   :  { %s2452_s19 = smov 0  }
   0x3 LB: > { %s23_s20 = sadd.s32 1, %s2405_s17  ;;  %s26_s21 = sadd.s32 1, %s2409_s18  ;;  %s2413_s19 = sphi %s2452_s19, %s14_s19   ;;  %s2409_s18 = sphi %s2450_s18, %s2981_s18   ;;  %s2405_s17 = sphi %s2448_s17, %s2980_s17   ;;  %s2401_s16 = sphi %s2446_s16, %s2979_s16   ;;  %s2397_s15 = sphi %s2444_s15, %s2978_s15  }
   0x4   : > { %p24_p0 = scmp.ge.s32.totalorder %s23_s20, 2  ;;  %p2226_p1 = scmp.ge.s32.totalorder %s2413_s19, 1 }
   0x5   : > { %p216_p2 = scmp.lt.s32.totalorder %s2413_s19, 5 }
   0x6   : > { %s2983_s20 = smov (%p24_p0, %s23_s20), 0  ;;  %s2985_s21 = smov (!%p24_p0, %s26_s21), %s2409_s18 }
   0x7   : > { %p217_p3 = pnand %p2226_p1, %p216_p2  ;;  %p28_p4 = scmp.ge.s32.totalorder %s2985_s21, 2 }
   0x8   : > { %s2474_s22 = sshll.u32 (!%p217_p3), %s2397_s15, 3  ;;  %p270_p5 = scmp.lt.s32.totalorder (!%p217_p3), %s2401_s16, 1 }
   0x9   : > { %s2987_s21 = smov (%p28_p4, %s2985_s21), 0  ;;  %220 = sbr.rel (%p217_p3) target bundleno = 488 (0x1e8), region = 36 }
   0xa   : > { %p272_p6 = scmp.lt.s32.totalorder (!%p217_p3), %s2474_s22, 17  ;;  %p300_p7 = scmp.lt.s32.totalorder (!%p217_p3), %s2474_s22, 15 }
   0xb   : > { %s2326_s7 = sadd.s32 (!%p217_p3), 8, %s2474_s22  ;;  %s2417_s8 = smov (!%p217_p3), 127  }
   0xc   : > { %p288_p8 = scmp.lt.s32.totalorder (!%p217_p3), %s2326_s7, 17  ;;  %s2418_s14 = smov (!%p217_p3), 126  }
   0xe   : > { %v317_v0 = vlaneseq  ;;  %v2415_v1 = vmov 1983009808   ;;  %s2989_s16 = smov (!%p270_p5, %s2401_s16), 1  ;;  %v2416_v8 = vmov 0   ;;  %s2991_s7 = smov (!%p288_p8, %s2326_s7), 17  ;;  %vm376_vm0 = vcmask 1039360  }
   0xf   : > { %v315_v2 = vunpack.c.l.s4 %v2415_v1  ;;  %s273_s23 = scalar_select %p272_p6, %s2474_s22, 17  ;;  %529 = vmatprep.mubr.bf16.mxu1 %v2416_v8  ;;  %488 = vmatprep.mubr.bf16.mxu0 %v2416_v8  ;;  %vm431_vm1 = vcmask 1041408   ;;  %v2236_v31 = vld [vmem:[%s2975_s2 + $0x4] sm:$0xf]  ;;  %vm427_vm2 = vcmask 31744   ;;  %vm410_vm3 = vcmask 1031168  }
  0x10   : > { %v318_v3 = vshrl.u32 %v317_v0, 7  ;;  %s2327_s24 = smul.u32 18, %s2989_s16  ;;  %s2233_s25 = sshll.u32 %s2989_s16, 4  ;;  %2372 = vset.pattern.permute.xlu0 %v2416_v8  ;;  %v424_v50 = vld [vmem:[%s2975_s2] sm:$0xf] }
  0x11   : > { %v316_v4 = vunpack.c.0.s8 %v315_v2  ;;  %s301_s26 = scalar_select %p300_p7, %s2474_s22, 15 }
  0x12   : > { %s275_s27 = sadd.s32 %s2327_s24, %s273_s23  ;;  %s291_s9 = sadd.s32 %s2327_s24, %s2991_s7 }
  0x13   : > { %v319_v5 = vsub.s32 %v316_v4, %v318_v3  ;;  %s2228_s28 = sshll.u32 %s275_s27, 1  ;;  %s2484_s29 = sadd.s32 %s2233_s25, %s301_s26 }
  0x14   : > { %s277_s6 = scalar_lea.vmem %s2973_s0, %s2228_s28  ;;  %s2231_s10 = sshll.u32 %s291_s9, 1 }
  0x15   : > { %v308_v6 = vld [vmem:[%s277_s6] sm:$0xff]  ;;  %v309_v7 = vld [vmem:[%s277_s6 + $0x8] sm:$0xff]  ;;  %s293_s13 = scalar_lea.vmem %s2974_s1, %s2231_s10  ;;  %s2234_s15 = sshll.u32 %s2484_s29, 3 }
  0x16   : > { %v2492_v9 = vrot.slane %v308_v6, %v319_v5  ;;  %v313_v10 = vcombine.high %v308_v6, %v308_v6  ;;  %v2495_v11 = vrot.slane %v309_v7, %v319_v5  ;;  %v330_v13 = vcombine.high %v309_v7, %v309_v7  ;;  %v2534_v19 = vld.sshfl [vmem:[%s293_s13] sm:$0x33 pattern:$0x76325410]  ;;  %v2253_v7 = vld [vmem:[%s2975_s2 + $0x8] sm:$0xf]  ;;  %s2936_s29 = scalar_lea.vmem %s2977_s4, %s2234_s15 }
  0x17   : > { %v2550_v20 = vcombine.high %v2534_v19, %v2534_v19 }
  0x18   : > { %356 = vrot.lane.b32.xlu0 %v2492_v9, %s2417_s8  ;;  %v2499_v12 = vrot.slane %v313_v10, %v319_v5  ;;  %v2511_v15 = vcombine.high %v2492_v9, %v2492_v9  ;;  %v2517_v16 = vcombine.high %v2495_v11, %v2495_v11  ;;  %v2519_v17 = vrot.slane %v330_v13, %v319_v5 }
  0x19   : > { %v624_v45 = vsel %vm431_vm1, %v2492_v9, 0  ;;  %v2639_v52 = vsel %vm431_vm1, %v2495_v11, 0 }
  0x1a   : > { %360 = vrot.lane.b32.xlu1 %v2499_v12, %s2417_s8  ;;  %v2505_v14 = vcombine.high %v2499_v12, %v2499_v12  ;;  %v2527_v18 = vcombine.high %v2519_v17, %v2519_v17  ;;  %v2623_v46 = vsel %vm431_vm1, %v2499_v12, 0  ;;  %v2643_v53 = vsel %vm431_vm1, %v2519_v17, 0 }
  0x1b   : > { %v627_v13 = vsel %vm431_vm1, %v2511_v15, 0 }
  0x1c   : > { %364 = vrot.lane.b32.xlu0 %v2495_v11, %s2417_s8 }
  0x1e   : > { %362 = vrot.lane.b32.xlu1 %v2505_v14, %s2417_s8 }
  0x20   : > { %358 = vrot.lane.b32.xlu0 %v2511_v15, %s2417_s8 }
  0x22   : > { %366 = vrot.lane.b32.xlu1 %v2517_v16, %s2417_s8 }
  0x24   : > { %368 = vrot.lane.b32.xlu0 %v2519_v17, %s2417_s8 }
  0x26   : > { %370 = vrot.lane.b32.xlu1 %v2527_v18, %s2417_s8 }
  0x28   : > { %372 = vrot.lane.b32.xlu0 %v2534_v19, %s2417_s8 }
  0x2a   : > { %390 = vrot.lane.b32.xlu1 %v2492_v9, %s2418_s14 }
  0x2c   : > { %392 = vrot.lane.b32.xlu0 %v2511_v15, %s2418_s14 }
  0x2e   : > { %394 = vrot.lane.b32.xlu1 %v2499_v12, %s2418_s14 }
  0x30   : > { %396 = vrot.lane.b32.xlu0 %v2505_v14, %s2418_s14 }
  0x32   : > { %398 = vrot.lane.b32.xlu1 %v2495_v11, %s2418_s14 }
  0x34   : > { %400 = vrot.lane.b32.xlu0 %v2517_v16, %s2418_s14 }
  0x36   : > { %402 = vrot.lane.b32.xlu1 %v2519_v17, %s2418_s14 }
  0x38   : > { %404 = vrot.lane.b32.xlu0 %v2527_v18, %s2418_s14 }
  0x3a   : > { %406 = vrot.lane.b32.xlu1 %v2534_v19, %s2418_s14 }
  0x3c   : > { %374 = vrot.lane.b32.xlu0 %v2550_v20, %s2417_s8 }
  0x3e   : > { %408 = vrot.lane.b32.xlu1 %v2550_v20, %s2418_s14 }
  0x8a   : > { %v2556_v21 = vpop.permute.xlu0 %356 }
  0x8c   : > { %v361_v22 = vpop.permute.xlu1 %360 }
  0x8e   : > { %v365_v23 = vpop.permute.xlu0 %364 }
  0x90   : > { %v363_v24 = vpop.permute.xlu1 %362 }
  0x91   : > { %v2559_v25 = vsel %vm376_vm0, %v363_v24, %v365_v23  ;;  %v2562_v26 = vsel %vm376_vm0, %v361_v22, %v363_v24  ;;  %v2271_v24 = vld [vmem:[%s2975_s2 + $0x10] sm:$0xf] }
  0x92   : > { %v359_v27 = vpop.permute.xlu0 %358  ;;  %2239 = vmatprep.subr.msk.bf16.mxu1 %vm431_vm1, %v2559_v25  ;;  %v2568_v28 = vsel %vm431_vm1, %v2562_v26, 0 }
  0x93   : > { %512 = vmatpush1.bf16.msra.mxu1 %v2568_v28  ;;  %v2572_v29 = vsel %vm376_vm0, %v359_v27, %v361_v22  ;;  %v377_v30 = vsel %vm376_vm0, %v2556_v21, %v359_v27  ;;  %v442_v22 = vsel %vm431_vm1, %v2559_v25, 0 }
  0x94   : > { %2237 = vmatprep.subr.msk.bf16.mxu0 %vm431_vm1, %v2572_v29  ;;  %v367_v32 = vpop.permute.xlu1 %366  ;;  %v433_v33 = vsel %vm431_vm1, %v377_v30, 0 }
  0x95   : > { %v2583_v34 = vsel %vm376_vm0, %v365_v23, %v367_v32  ;;  %471 = vmatpush1.bf16.msra.mxu0 %v433_v33  ;;  %v2280_v33 = vld [vmem:[%s2975_s2 + $0x14] sm:$0xf] }
  0x96   : > { %v369_v35 = vpop.permute.xlu0 %368  ;;  %2240 = vmatmul.mubr.msk.bf16.vlgmr.msra.gmra.mxu1 %vm427_vm2, %v2236_v31  ;;  %v2592_v37 = vsel %vm431_vm1, %v2583_v34, 0 }
  0x97   : > { %v2587_v36 = vsel %vm376_vm0, %v367_v32, %v369_v35  ;;  %611 = vmatprep.mubr.bf16.mxu1 %v2416_v8 }
  0x98   : > { %2238 = vmatmul.mubr.msk.bf16.vlgmr.msra.gmra.mxu0 %vm427_vm2, %v2236_v31  ;;  %2241 = vmatprep.subr.msk.bf16.mxu0 %vm431_vm1, %v2587_v36  ;;  %v371_v38 = vpop.permute.xlu1 %370 }
  0x99   : > { %v2598_v39 = vsel %vm376_vm0, %v369_v35, %v371_v38  ;;  %553 = vmatpush1.bf16.msra.mxu0 %v2592_v37  ;;  %570 = vmatprep.mubr.bf16.mxu0 %v2416_v8 }
  0x9a   : > { %v2602_v40 = vpop.permute.xlu0 %372  ;;  %2245 = vmatprep.subr.msk.bf16.mxu0 %vm431_vm1, %v2511_v15  ;;  %v2612_v42 = vsel %vm431_vm1, %v2598_v39, 0  ;;  %v645_v15 = vsel %vm431_vm1, %v2527_v18, 0 }
  0x9b   : > { %v2608_v41 = vsel %vm376_vm0, %v371_v38, %v2602_v40 }
  0x9c   : > { %2243 = vmatprep.subr.msk.bf16.mxu1 %vm431_vm1, %v2608_v41  ;;  %v391_v43 = vpop.permute.xlu1 %390  ;;  %v454_v27 = vsel %vm431_vm1, %v2608_v41, 0 }
  0x9d   : > { %594 = vmatpush1.bf16.msra.mxu1 %v2612_v42 }
  0x9e   : > { %v393_v44 = vpop.permute.xlu0 %392  ;;  %2247 = vmatprep.subr.msk.bf16.mxu1 %vm431_vm1, %v2505_v14 }
  0x9f   : > { %v411_v60 = vsel %vm410_vm3, %v391_v43, %v393_v44 }
  0xa0   : > { %2242 = vmatmul.mubr.msk.bf16.vlgmr.msra.gmra.mxu0 %vm427_vm2, %v2236_v31  ;;  %2244 = vmatmul.mubr.msk.bf16.vlgmr.msra.gmra.mxu1 %vm427_vm2, %v2236_v31  ;;  %v395_v47 = vpop.permute.xlu1 %394  ;;  %v817_v0 = vsel %vm431_vm1, %v411_v60, 0 }
  0xa1   : > { %662 = vmatpush1.bf16.msra.mxu0 %v624_v45  ;;  %703 = vmatpush1.bf16.msra.mxu1 %v2623_v46  ;;  %v2646_v54 = vsel %vm410_vm3, %v393_v44, %v395_v47 }
  0xa2   : > { %v397_v48 = vpop.permute.xlu0 %396  ;;  %679 = vmatprep.mubr.bf16.mxu0 %v2416_v8  ;;  %720 = vmatprep.mubr.bf16.mxu1 %v2416_v8  ;;  %v820_v30 = vsel %vm431_vm1, %v2646_v54, 0 }
  0xa3   : > { %2249 = vmatprep.subr.msk.bf16.mxu0 %vm431_vm1, %v2517_v16  ;;  %2251 = vmatprep.subr.msk.bf16.mxu1 %vm431_vm1, %v2527_v18  ;;  %v2658_v58 = vsel %vm410_vm3, %v395_v47, %v397_v48 }
  0xa4   : > { %v399_v49 = vpop.permute.xlu1 %398  ;;  %v2669_v61 = vsel %vm431_vm1, %v2658_v58, 0 }
  0xa5   : > { %v2649_v55 = vsel %vm410_vm3, %v397_v48, %v399_v49 }
  0xa6   : > { %v401_v51 = vpop.permute.xlu0 %400  ;;  %v826_v31 = vsel %vm431_vm1, %v2649_v55, 0 }
  0xa7   : > { %v415_v6 = vsel %vm410_vm3, %v399_v49, %v401_v51 }
  0xa8   : > { %2246 = vmatmul.mubr.msk.bf16.vlgmr.msra.gmra.mxu0 %vm427_vm2, %v424_v50  ;;  %2248 = vmatmul.mubr.msk.bf16.vlgmr.msra.gmra.mxu1 %vm427_vm2, %v424_v50  ;;  %v403_v56 = vpop.permute.xlu1 %402  ;;  %v2710_v10 = vsel %vm431_vm1, %v415_v6, 0 }
  0xa9   : > { %744 = vmatpush1.bf16.msra.mxu0 %v2639_v52  ;;  %785 = vmatpush1.bf16.msra.mxu1 %v2643_v53  ;;  %v2677_v1 = vsel %vm410_vm3, %v401_v51, %v403_v56 }
  0xaa   : > { %v405_v57 = vpop.permute.xlu0 %404  ;;  %761 = vmatprep.mubr.bf16.mxu0 %v2416_v8  ;;  %802 = vmatprep.mubr.bf16.mxu1 %v2416_v8 }
  0xab   : > { %2254 = vmatprep.subr.msk.bf16.mxu0 %vm431_vm1, %v2646_v54  ;;  %2256 = vmatprep.subr.msk.bf16.mxu1 %vm431_vm1, %v2649_v55  ;;  %v2695_v5 = vsel %vm410_vm3, %v403_v56, %v405_v57 }
  0xac   : > { %v2664_v59 = vpop.permute.xlu1 %406  ;;  %v2707_v9 = vsel %vm431_vm1, %v2695_v5, 0 }
  0xad   : > { %v2681_v2 = vsel %vm410_vm3, %v405_v57, %v2664_v59 }
  0xae   : > { %v375_v62 = vpop.permute.xlu0 %374  ;;  %v838_v35 = vsel %vm431_vm1, %v2681_v2, 0 }
  0xaf   : > { %v2673_v63 = vsel %vm376_vm0, %v375_v62, %v2556_v21  ;;  %v633_v21 = vsel %vm431_vm1, %v2505_v14, 0  ;;  %v2757_v23 = vsel %vm376_vm0, %v2602_v40, %v375_v62 }
  0xb0   : > { %2250 = vmatmul.mubr.msk.bf16.vlgmr.msra.gmra.mxu0 %vm427_vm2, %v424_v50  ;;  %2252 = vmatmul.mubr.msk.bf16.vlgmr.msra.gmra.mxu1 %vm427_vm2, %v424_v50  ;;  %v2685_v3 = vpop.permute.xlu1 %408 }
  0xb1   : > { %855 = vmatpush1.bf16.msra.mxu0 %v817_v0  ;;  %v2689_v4 = vsel %vm410_vm3, %v2685_v3, %v391_v43  ;;  %896 = vmatpush1.bf16.msra.mxu1 %v2669_v61  ;;  %v2791_v32 = vsel %vm410_vm3, %v2664_v59, %v2685_v3 }
  0xb2   : > { %872 = vmatprep.mubr.bf16.mxu0 %v2416_v8  ;;  %913 = vmatprep.mubr.bf16.mxu1 %v2416_v8 }
  0xb3   : > { %2258 = vmatprep.subr.msk.bf16.mxu0 %vm431_vm1, %v2677_v1  ;;  %2260 = vmatprep.subr.msk.bf16.mxu1 %vm431_vm1, %v2681_v2 }
  0xb8   : > { %2255 = vmatmul.mubr.msk.bf16.vlgmr.msra.gmra.mxu0 %vm427_vm2, %v2253_v7  ;;  %2257 = vmatmul.mubr.msk.bf16.vlgmr.msra.gmra.mxu1 %vm427_vm2, %v2253_v7 }
  0xb9   : > { %937 = vmatpush1.bf16.msra.mxu0 %v2710_v10  ;;  %978 = vmatpush1.bf16.msra.mxu1 %v2707_v9 }
  0xba   : > { %954 = vmatprep.mubr.bf16.mxu0 %v2416_v8  ;;  %995 = vmatprep.mubr.bf16.mxu1 %v2416_v8 }
  0xbb   : > { %2263 = vmatprep.subr.msk.bf16.mxu0 %vm431_vm1, %v2499_v12  ;;  %2265 = vmatprep.subr.msk.bf16.mxu1 %vm431_vm1, %v2495_v11  ;;  %v2262_v11 = vld [vmem:[%s2975_s2 + $0xc] sm:$0xf]  ;;  %v639_v12 = vsel %vm431_vm1, %v2517_v16, 0 }
  0xc0   : > { %2259 = vmatmul.mubr.msk.bf16.vlgmr.msra.gmra.mxu0 %vm427_vm2, %v2253_v7  ;;  %2261 = vmatmul.mubr.msk.bf16.vlgmr.msra.gmra.mxu1 %vm427_vm2, %v2253_v7 }
  0xc1   : > { %1035 = vmatpush1.bf16.msra.mxu0 %v627_v13  ;;  %1076 = vmatpush1.bf16.msra.mxu1 %v633_v21 }
  0xc2   : > { %1052 = vmatprep.mubr.bf16.mxu0 %v2416_v8  ;;  %1093 = vmatprep.mubr.bf16.mxu1 %v2416_v8 }
  0xc3   : > { %2267 = vmatprep.subr.msk.bf16.mxu0 %vm431_vm1, %v2519_v17  ;;  %2269 = vmatprep.subr.msk.bf16.mxu1 %vm431_vm1, %v2534_v19  ;;  %v436_v17 = vsel %vm431_vm1, %v2572_v29, 0  ;;  %v2090_v29 = vld [vmem:[%s2976_s3] sm:$0xff] }
  0xc4   : > { %2093 = vperm.xlu0 %2372, %v2090_v29  }
  0xc8   : > { %2264 = vmatmul.mubr.msk.bf16.vlgmr.msra.gmra.mxu0 %vm427_vm2, %v2262_v11  ;;  %2266 = vmatmul.mubr.msk.bf16.vlgmr.msra.gmra.mxu1 %vm427_vm2, %v2262_v11 }
  0xc9   : > { %1117 = vmatpush1.bf16.msra.mxu0 %v639_v12  ;;  %1158 = vmatpush1.bf16.msra.mxu1 %v645_v15 }
  0xca   : > { %2272 = vmatprep.subr.msk.bf16.mxu0 %vm431_vm1, %v2562_v26  ;;  %2274 = vmatprep.subr.msk.bf16.mxu1 %vm431_vm1, %v2583_v34  ;;  %v448_v26 = vsel %vm431_vm1, %v2587_v36, 0  ;;  %v832_v34 = vsel %vm431_vm1, %v2677_v1, 0 }
  0xcb   : > { %1134 = vmatprep.mubr.bf16.mxu0 %v2416_v8  ;;  %1175 = vmatprep.mubr.bf16.mxu1 %v2416_v8 }
  0xd0   : > { %2268 = vmatmul.mubr.msk.bf16.vlgmr.msra.gmra.mxu0 %vm427_vm2, %v2262_v11  ;;  %2270 = vmatmul.mubr.msk.bf16.vlgmr.msra.gmra.mxu1 %vm427_vm2, %v2262_v11 }
  0xd1   : > { %1215 = vmatpush1.bf16.msra.mxu0 %v436_v17  ;;  %1256 = vmatpush1.bf16.msra.mxu1 %v442_v22 }
  0xd2   : > { %2276 = vmatprep.subr.msk.bf16.mxu0 %vm431_vm1, %v2598_v39  ;;  %2278 = vmatprep.subr.msk.bf16.mxu1 %vm431_vm1, %v2757_v23 }
  0xd3   : > { %1232 = vmatprep.mubr.bf16.mxu0 %v2416_v8  ;;  %1273 = vmatprep.mubr.bf16.mxu1 %v2416_v8 }
  0xd8   : > { %2273 = vmatmul.mubr.msk.bf16.vlgmr.msra.gmra.mxu0 %vm427_vm2, %v2271_v24  ;;  %2275 = vmatmul.mubr.msk.bf16.vlgmr.msra.gmra.mxu1 %vm427_vm2, %v2271_v24 }
  0xd9   : > { %1297 = vmatpush1.bf16.msra.mxu0 %v448_v26  ;;  %1338 = vmatpush1.bf16.msra.mxu1 %v454_v27 }
  0xda   : > { %2281 = vmatprep.subr.msk.bf16.mxu0 %vm431_vm1, %v2658_v58  ;;  %2283 = vmatprep.subr.msk.bf16.mxu1 %vm431_vm1, %v415_v6 }
  0xdb   : > { %1314 = vmatprep.mubr.bf16.mxu0 %v2416_v8  ;;  %1355 = vmatprep.mubr.bf16.mxu1 %v2416_v8 }
  0xe0   : > { %2277 = vmatmul.mubr.msk.bf16.vlgmr.msra.gmra.mxu0 %vm427_vm2, %v2271_v24  ;;  %2279 = vmatmul.mubr.msk.bf16.vlgmr.msra.gmra.mxu1 %vm427_vm2, %v2271_v24 }
  0xe1   : > { %1395 = vmatpush1.bf16.msra.mxu0 %v820_v30  ;;  %1436 = vmatpush1.bf16.msra.mxu1 %v826_v31 }
  0xe2   : > { %2285 = vmatprep.subr.msk.bf16.mxu0 %vm431_vm1, %v2695_v5  ;;  %2287 = vmatprep.subr.msk.bf16.mxu1 %vm431_vm1, %v2791_v32 }
  0xe3   : > { %1412 = vmatprep.mubr.bf16.mxu0 %v2416_v8  ;;  %1453 = vmatprep.mubr.bf16.mxu1 %v2416_v8 }
  0xe8   : > { %2282 = vmatmul.mubr.msk.bf16.vlgmr.msra.gmra.mxu0 %vm427_vm2, %v2280_v33  ;;  %2284 = vmatmul.mubr.msk.bf16.vlgmr.msra.gmra.mxu1 %vm427_vm2, %v2280_v33 }
  0xe9   : > { %1477 = vmatpush1.bf16.msra.mxu0 %v832_v34  ;;  %1518 = vmatpush1.bf16.msra.mxu1 %v838_v35 }
  0xea   : > { %1494 = vmatprep.mubr.bf16.mxu0 %v2416_v8  ;;  %1535 = vmatprep.mubr.bf16.mxu1 %v2416_v8 }
  0xeb   : > { %2290 = vmatprep.subr.msk.bf16.mxu0 %vm431_vm1, %v2505_v14  ;;  %2292 = vmatprep.subr.msk.bf16.mxu1 %vm431_vm1, %v2517_v16  ;;  %v2289_v14 = vld [vmem:[%s2975_s2 + $0x18] sm:$0xf]  ;;  %v1018_v16 = vsel %vm431_vm1, %v2534_v19, 0  ;;  %v1198_v19 = vsel %vm431_vm1, %v2757_v23, 0 }
  0xf0   : > { %2286 = vmatmul.mubr.msk.bf16.vlgmr.msra.gmra.mxu0 %vm427_vm2, %v2280_v33  ;;  %2288 = vmatmul.mubr.msk.bf16.vlgmr.msra.gmra.mxu1 %vm427_vm2, %v2280_v33 }
  0xf1   : > { %1575 = vmatpush1.bf16.msra.mxu0 %v2623_v46  ;;  %1616 = vmatpush1.bf16.msra.mxu1 %v2639_v52 }
  0xf2   : > { %1592 = vmatprep.mubr.bf16.mxu0 %v2416_v8  ;;  %1633 = vmatprep.mubr.bf16.mxu1 %v2416_v8 }
  0xf3   : > { %2294 = vmatprep.subr.msk.bf16.mxu0 %vm431_vm1, %v2527_v18  ;;  %2296 = vmatprep.subr.msk.bf16.mxu1 %vm431_vm1, %v2550_v20  ;;  %v2298_v18 = vld [vmem:[%s2975_s2 + $0x1c] sm:$0xf]  ;;  %v2307_v20 = vld [vmem:[%s2975_s2 + $0x20] sm:$0xf] }
  0xf8   : > { %2291 = vmatmul.mubr.msk.bf16.vlgmr.msra.gmra.mxu0 %vm427_vm2, %v2289_v14  ;;  %2293 = vmatmul.mubr.msk.bf16.vlgmr.msra.gmra.mxu1 %vm427_vm2, %v2289_v14 }
  0xf9   : > { %1657 = vmatpush1.bf16.msra.mxu0 %v2643_v53  ;;  %1698 = vmatpush1.bf16.msra.mxu1 %v1018_v16 }
  0xfa   : > { %2299 = vmatprep.subr.msk.bf16.mxu0 %vm431_vm1, %v2559_v25  ;;  %2301 = vmatprep.subr.msk.bf16.mxu1 %vm431_vm1, %v2587_v36  ;;  %v1378_v25 = vsel %vm431_vm1, %v2791_v32, 0 }
  0xfb   : > { %1674 = vmatprep.mubr.bf16.mxu0 %v2416_v8  ;;  %1715 = vmatprep.mubr.bf16.mxu1 %v2416_v8 }
 0x100   : > { %2295 = vmatmul.mubr.msk.bf16.vlgmr.msra.gmra.mxu0 %vm427_vm2, %v2289_v14  ;;  %2297 = vmatmul.mubr.msk.bf16.vlgmr.msra.gmra.mxu1 %vm427_vm2, %v2289_v14 }
 0x101   : > { %1754 = vmatpush1.bf16.msra.mxu0 %v2568_v28  ;;  %1795 = vmatpush1.bf16.msra.mxu1 %v2592_v37 }
 0x102   : > { %2303 = vmatprep.subr.msk.bf16.mxu0 %vm431_vm1, %v2608_v41  ;;  %2305 = vmatprep.subr.msk.bf16.mxu1 %vm431_vm1, %v2673_v63 }
 0x103   : > { %1771 = vmatprep.mubr.bf16.mxu0 %v2416_v8  ;;  %1812 = vmatprep.mubr.bf16.mxu1 %v2416_v8 }
 0x108   : > { %2300 = vmatmul.mubr.msk.bf16.vlgmr.msra.gmra.mxu0 %vm427_vm2, %v2298_v18  ;;  %2302 = vmatmul.mubr.msk.bf16.vlgmr.msra.gmra.mxu1 %vm427_vm2, %v2298_v18 }
 0x109   : > { %1836 = vmatpush1.bf16.msra.mxu0 %v2612_v42  ;;  %1877 = vmatpush1.bf16.msra.mxu1 %v1198_v19 }
 0x10a   : > { %2308 = vmatprep.subr.msk.bf16.mxu0 %vm431_vm1, %v2649_v55  ;;  %2310 = vmatprep.subr.msk.bf16.mxu1 %vm431_vm1, %v2677_v1 }
 0x10b   : > { %1853 = vmatprep.mubr.bf16.mxu0 %v2416_v8  ;;  %1894 = vmatprep.mubr.bf16.mxu1 %v2416_v8 }
 0x110   : > { %2304 = vmatmul.mubr.msk.bf16.vlgmr.msra.gmra.mxu0 %vm427_vm2, %v2298_v18  ;;  %2306 = vmatmul.mubr.msk.bf16.vlgmr.msra.gmra.mxu1 %vm427_vm2, %v2298_v18 }
 0x111   : > { %1933 = vmatpush1.bf16.msra.mxu0 %v2669_v61  ;;  %1974 = vmatpush1.bf16.msra.mxu1 %v2710_v10 }
 0x112   : > { %2312 = vmatprep.subr.msk.bf16.mxu0 %vm431_vm1, %v2681_v2  ;;  %2314 = vmatprep.subr.msk.bf16.mxu1 %vm431_vm1, %v2689_v4 }
 0x113   : > { %1950 = vmatprep.mubr.bf16.mxu0 %v2416_v8  ;;  %1991 = vmatprep.mubr.bf16.mxu1 %v2416_v8 }
 0x118   : > { %2309 = vmatmul.mubr.msk.bf16.vlgmr.msra.gmra.mxu0 %vm427_vm2, %v2307_v20  ;;  %2311 = vmatmul.mubr.msk.bf16.vlgmr.msra.gmra.mxu1 %vm427_vm2, %v2307_v20 }
 0x119   : > { %2015 = vmatpush1.bf16.msra.mxu0 %v2707_v9  ;;  %2056 = vmatpush1.bf16.msra.mxu1 %v1378_v25 }
 0x11a   : > { %2032 = vmatprep.mubr.bf16.mxu0 %v2416_v8  ;;  %2073 = vmatprep.mubr.bf16.mxu1 %v2416_v8 }
 0x120   : > { %2313 = vmatmul.mubr.msk.bf16.vlgmr.msra.gmra.mxu0 %vm427_vm2, %v2307_v20  ;;  %2315 = vmatmul.mubr.msk.bf16.vlgmr.msra.gmra.mxu1 %vm427_vm2, %v2307_v20 }
 0x156   : > { %v531_v28 = vpop.f32.mrf.mxu1 }
 0x158   : > { %v490_v36 = vpop.f32.mrf.mxu0  ;;  %v533_v37 = vpop.f32.mrf.mxu1 }
 0x15a   : > { %v492_v38 = vpop.f32.mrf.mxu0  ;;  %v535_v39 = vpop.f32.mrf.mxu1 }
 0x15c   : > { %v494_v40 = vpop.f32.mrf.mxu0  ;;  %v536_v41 = vpop.f32.mrf.mxu1 }
 0x15e   : > { %v495_v42 = vpop.f32.mrf.mxu0 }
 0x160   : > { %v572_v43 = vpop.f32.mrf.mxu0  ;;  %v613_v44 = vpop.f32.mrf.mxu1 }
 0x162   : > { %v574_v45 = vpop.f32.mrf.mxu0  ;;  %v615_v46 = vpop.f32.mrf.mxu1 }
 0x164   : > { %v576_v47 = vpop.f32.mrf.mxu0  ;;  %v617_v48 = vpop.f32.mrf.mxu1 }
 0x166   : > { %v577_v49 = vpop.f32.mrf.mxu0  ;;  %v618_v8 = vpop.f32.mrf.mxu1 }
 0x168   : > { %v681_v50 = vpop.f32.mrf.mxu0  ;;  %v722_v51 = vpop.f32.mrf.mxu1 }
 0x169   : > { %v682_v52 = vadd.f32 %v681_v50, %v490_v36  ;;  %v723_v53 = vadd.f32 %v722_v51, %v531_v28 }
 0x16a   : > { %v683_v54 = vpop.f32.mrf.mxu0  ;;  %v724_v55 = vpop.f32.mrf.mxu1 }
 0x16b   : > { %v684_v56 = vadd.f32 %v683_v54, %v492_v38  ;;  %v725_v57 = vadd.f32 %v724_v55, %v533_v37 }
 0x16c   : > { %v685_v58 = vpop.f32.mrf.mxu0  ;;  %v726_v59 = vpop.f32.mrf.mxu1 }
 0x16e   : > { %v686_v60 = vpop.f32.mrf.mxu0  ;;  %v727_v61 = vpop.f32.mrf.mxu1 }
 0x170   : > { %v763_v62 = vpop.f32.mrf.mxu0  ;;  %v804_v63 = vpop.f32.mrf.mxu1 }
 0x171   : > { %v764_v0 = vadd.f32 %v763_v62, %v572_v43  ;;  %v805_v1 = vadd.f32 %v804_v63, %v613_v44 }
 0x172   : > { %v765_v2 = vpop.f32.mrf.mxu0  ;;  %v806_v3 = vpop.f32.mrf.mxu1 }
 0x173   : > { %v766_v4 = vadd.f32 %v765_v2, %v574_v45  ;;  %v807_v5 = vadd.f32 %v806_v3, %v615_v46 }
 0x174   : > { %v767_v6 = vpop.f32.mrf.mxu0  ;;  %v808_v7 = vpop.f32.mrf.mxu1 }
 0x176   : > { %v768_v9 = vpop.f32.mrf.mxu0  ;;  %v809_v10 = vpop.f32.mrf.mxu1 }
 0x178   : > { %v874_v13 = vpop.f32.mrf.mxu0  ;;  %v915_v21 = vpop.f32.mrf.mxu1 }
 0x179   : > { %v1004_v11 = vadd.f32 %v874_v13, %v682_v52  ;;  %v1006_v12 = vadd.f32 %v915_v21, %v723_v53 }
 0x17a   : > { %v876_v15 = vpop.f32.mrf.mxu0  ;;  %v917_v17 = vpop.f32.mrf.mxu1 }
 0x17b   : > { %v1005_v22 = vadd.f32 %v876_v15, %v684_v56  ;;  %v1007_v23 = vadd.f32 %v917_v17, %v725_v57 }
 0x17c   : > { %v878_v24 = vpop.f32.mrf.mxu0  ;;  %v919_v26 = vpop.f32.mrf.mxu1 }
 0x17e   : > { %v879_v27 = vpop.f32.mrf.mxu0  ;;  %v920_v29 = vpop.f32.mrf.mxu1 }
 0x180   : > { %v956_v30 = vpop.f32.mrf.mxu0  ;;  %v997_v31 = vpop.f32.mrf.mxu1 }
 0x181   : > { %v1008_v32 = vadd.f32 %v956_v30, %v764_v0  ;;  %v1010_v33 = vadd.f32 %v997_v31, %v805_v1 }
 0x182   : > { %v958_v34 = vpop.f32.mrf.mxu0  ;;  %v999_v35 = vpop.f32.mrf.mxu1 }
 0x183   : > { %v1009_v14 = vadd.f32 %v958_v34, %v766_v4  ;;  %v1011_v16 = vadd.f32 %v999_v35, %v807_v5 }
 0x184   : > { %v960_v18 = vpop.f32.mrf.mxu0  ;;  %v1001_v19 = vpop.f32.mrf.mxu1 }
 0x186   : > { %v961_v20 = vpop.f32.mrf.mxu0  ;;  %v1002_v25 = vpop.f32.mrf.mxu1 }
 0x188   : > { %v1054_v28 = vpop.f32.mrf.mxu0  ;;  %v1095_v36 = vpop.f32.mrf.mxu1 }
 0x189   : > { %v2884_v37 = vadd.f32 %v1054_v28, %v1004_v11  ;;  %v2886_v38 = vadd.f32 %v1095_v36, %v1006_v12 }
 0x18a   : > { %v1056_v39 = vpop.f32.mrf.mxu0  ;;  %v1097_v40 = vpop.f32.mrf.mxu1 }
 0x18b   : > { %v2888_v41 = vadd.f32 %v1056_v39, %v1005_v22  ;;  %v2890_v42 = vadd.f32 %v1097_v40, %v1007_v23 }
 0x18c   : > { %v1058_v43 = vpop.f32.mrf.mxu0  ;;  %v1099_v44 = vpop.f32.mrf.mxu1 }
 0x18e   : > { %v1059_v45 = vpop.f32.mrf.mxu0  ;;  %v1100_v46 = vpop.f32.mrf.mxu1 }
 0x190   : > { %v1136_v47 = vpop.f32.mrf.mxu0  ;;  %v1177_v48 = vpop.f32.mrf.mxu1 }
 0x191   : > { %v2892_v49 = vadd.f32 %v1136_v47, %v1008_v32  ;;  %v2894_v8 = vadd.f32 %v1177_v48, %v1010_v33 }
 0x192   : > { %v1138_v50 = vpop.f32.mrf.mxu0  ;;  %v1179_v51 = vpop.f32.mrf.mxu1 }
 0x193   : > { %v2896_v52 = vadd.f32 %v1138_v50, %v1009_v14  ;;  %v2898_v53 = vadd.f32 %v1179_v51, %v1011_v16 }
 0x194   : > { %v1140_v54 = vpop.f32.mrf.mxu0  ;;  %v1181_v55 = vpop.f32.mrf.mxu1 }
 0x196   : > { %v1141_v56 = vpop.f32.mrf.mxu0  ;;  %v1182_v57 = vpop.f32.mrf.mxu1 }
 0x198   : > { %v1234_v58 = vpop.f32.mrf.mxu0  ;;  %v1275_v59 = vpop.f32.mrf.mxu1 }
 0x19a   : > { %v1236_v60 = vpop.f32.mrf.mxu0  ;;  %v1277_v61 = vpop.f32.mrf.mxu1 }
 0x19c   : > { %v1238_v62 = vpop.f32.mrf.mxu0  ;;  %v1279_v63 = vpop.f32.mrf.mxu1 }
 0x19e   : > { %v1239_v0 = vpop.f32.mrf.mxu0  ;;  %v1280_v1 = vpop.f32.mrf.mxu1 }
 0x19f   : > { %v1364_v0 = vadd.f32 %v1234_v58, %v2884_v37  ;;  %v1366_v1 = vadd.f32 %v1275_v59, %v2886_v38 }
 0x1a0   : > { %v2900_v2 = vpop.f32.mrf.mxu0  ;;  %v2902_v3 = vpop.f32.mrf.mxu1 }
 0x1a2   : > { %v2904_v4 = vpop.f32.mrf.mxu0  ;;  %v2906_v5 = vpop.f32.mrf.mxu1 }
 0x1a4   : > { %v1320_v6 = vpop.f32.mrf.mxu0  ;;  %v1361_v7 = vpop.f32.mrf.mxu1 }
 0x1a6   : > { %v1321_v9 = vpop.f32.mrf.mxu0  ;;  %v1362_v10 = vpop.f32.mrf.mxu1 }
 0x1a7   : > { %v1365_v9 = vadd.f32 %v1236_v60, %v2888_v41  ;;  %v1367_v10 = vadd.f32 %v1277_v61, %v2890_v42  ;;  %v1368_v41 = vadd.f32 %v2900_v2, %v2892_v49  ;;  %v1370_v42 = vadd.f32 %v2902_v3, %v2894_v8 }
 0x1a8   : > { %v1414_v13 = vpop.f32.mrf.mxu0  ;;  %v1455_v21 = vpop.f32.mrf.mxu1  ;;  %v1371_v49 = vadd.f32 %v2906_v5, %v2898_v53 }
 0x1aa   : > { %v1416_v11 = vpop.f32.mrf.mxu0  ;;  %v1457_v12 = vpop.f32.mrf.mxu1 }
 0x1ac   : > { %v1418_v15 = vpop.f32.mrf.mxu0  ;;  %v1459_v17 = vpop.f32.mrf.mxu1 }
 0x1ad   : > { %v1544_v15 = vadd.f32 %v1414_v13, %v1364_v0  ;;  %v1546_v17 = vadd.f32 %v1455_v21, %v1366_v1 }
 0x1ae   : > { %v1419_v22 = vpop.f32.mrf.mxu0  ;;  %v1460_v23 = vpop.f32.mrf.mxu1 }
 0x1b0   : > { %v2908_v24 = vpop.f32.mrf.mxu0  ;;  %v2910_v26 = vpop.f32.mrf.mxu1 }
 0x1b1   : > { %v1548_v8 = vadd.f32 %v2908_v24, %v1368_v41  ;;  %v1550_v2 = vadd.f32 %v2910_v26, %v1370_v42 }
 0x1b2   : > { %v2912_v27 = vpop.f32.mrf.mxu0  ;;  %v2914_v29 = vpop.f32.mrf.mxu1 }
 0x1b4   : > { %v1500_v30 = vpop.f32.mrf.mxu0  ;;  %v1541_v31 = vpop.f32.mrf.mxu1 }
 0x1b5   : > { %v1545_v30 = vadd.f32 %v1416_v11, %v1365_v9  ;;  %v1547_v31 = vadd.f32 %v1457_v12, %v1367_v10 }
 0x1b6   : > { %v1501_v32 = vpop.f32.mrf.mxu0  ;;  %v1542_v33 = vpop.f32.mrf.mxu1 }
 0x1b8   : > { %v1594_v34 = vpop.f32.mrf.mxu0  ;;  %v1635_v35 = vpop.f32.mrf.mxu1 }
 0x1b9   : > { %v1724_v32 = vadd.f32 %v1594_v34, %v1544_v15  ;;  %v1726_v33 = vadd.f32 %v1635_v35, %v1546_v17  ;;  %v1369_v34 = vadd.f32 %v2904_v4, %v2896_v52  ;;  %v1551_v52 = vadd.f32 %v2914_v29, %v1371_v49 }
 0x1ba   : > { %v1596_v14 = vpop.f32.mrf.mxu0  ;;  %v1637_v16 = vpop.f32.mrf.mxu1 }
 0x1bb   : > { %v1725_v37 = vadd.f32 %v1596_v14, %v1545_v30  ;;  %v1727_v58 = vadd.f32 %v1637_v16, %v1547_v31 }
 0x1bc   : > { %v1598_v18 = vpop.f32.mrf.mxu0  ;;  %v1639_v19 = vpop.f32.mrf.mxu1 }
 0x1be   : > { %v1599_v20 = vpop.f32.mrf.mxu0  ;;  %v1640_v25 = vpop.f32.mrf.mxu1 }
 0x1bf   : > { %v2094_v20 = vpop.permute.xlu0 %2093 }
 0x1c0   : > { %v2916_v28 = vpop.f32.mrf.mxu0  ;;  %v2918_v36 = vpop.f32.mrf.mxu1 }
 0x1c1   : > { %v1728_v53 = vadd.f32 %v2916_v28, %v1548_v8  ;;  %v1730_v5 = vadd.f32 %v2918_v36, %v1550_v2 }
 0x1c2   : > { %v2920_v39 = vpop.f32.mrf.mxu0  ;;  %v2922_v40 = vpop.f32.mrf.mxu1 }
 0x1c4   : > { %v1680_v43 = vpop.f32.mrf.mxu0  ;;  %v1721_v44 = vpop.f32.mrf.mxu1 }
 0x1c5   : > { %v1549_v44 = vadd.f32 %v2912_v27, %v1369_v34  ;;  %v1731_v27 = vadd.f32 %v2922_v40, %v1551_v52 }
 0x1c6   : > { %v1681_v45 = vpop.f32.mrf.mxu0  ;;  %v1722_v46 = vpop.f32.mrf.mxu1 }
 0x1c8   : > { %v1773_v47 = vpop.f32.mrf.mxu0  ;;  %v1814_v48 = vpop.f32.mrf.mxu1 }
 0x1c9   : > { %v1903_v38 = vadd.f32 %v1773_v47, %v1724_v32  ;;  %v1905_v59 = vadd.f32 %v1814_v48, %v1726_v33  ;;  %v1729_v48 = vadd.f32 %v2920_v39, %v1549_v44 }
 0x1ca   : > { %v1775_v50 = vpop.f32.mrf.mxu0  ;;  %v1816_v51 = vpop.f32.mrf.mxu1 }
 0x1cb   : > { %v1904_v13 = vadd.f32 %v1775_v50, %v1725_v37  ;;  %v1906_v21 = vadd.f32 %v1816_v51, %v1727_v58 }
 0x1cc   : > { %v1777_v54 = vpop.f32.mrf.mxu0  ;;  %v1818_v55 = vpop.f32.mrf.mxu1 }
 0x1ce   : > { %v1778_v56 = vpop.f32.mrf.mxu0  ;;  %v1819_v57 = vpop.f32.mrf.mxu1 }
 0x1d0   : > { %v1855_v62 = vpop.f32.mrf.mxu0  ;;  %v1896_v63 = vpop.f32.mrf.mxu1 }
 0x1d1   : > { %v1907_v50 = vadd.f32 %v1855_v62, %v1728_v53  ;;  %v1909_v51 = vadd.f32 %v1896_v63, %v1730_v5 }
 0x1d2   : > { %v1857_v6 = vpop.f32.mrf.mxu0  ;;  %v1898_v7 = vpop.f32.mrf.mxu1 }
 0x1d3   : > { %v1908_v54 = vadd.f32 %v1857_v6, %v1729_v48  ;;  %v1910_v36 = vadd.f32 %v1898_v7, %v1731_v27 }
 0x1d4   : > { %v1859_v22 = vpop.f32.mrf.mxu0  ;;  %v1900_v23 = vpop.f32.mrf.mxu1 }
 0x1d6   : > { %v1860_v18 = vpop.f32.mrf.mxu0  ;;  %v1901_v19 = vpop.f32.mrf.mxu1 }
 0x1d8   : > { %v1952_v60 = vpop.f32.mrf.mxu0  ;;  %v1993_v61 = vpop.f32.mrf.mxu1 }
 0x1d9   : > { %v2082_v11 = vadd.f32 %v1952_v60, %v1903_v38  ;;  %v2084_v12 = vadd.f32 %v1993_v61, %v1905_v59 }
 0x1da   : > { %v1954_v3 = vpop.f32.mrf.mxu0  ;;  %v1995_v35 = vpop.f32.mrf.mxu1 }
 0x1db   : > { %v2096_v14 = vadd.f32 %v2094_v20, %v2082_v11  ;;  %v2098_v16 = vadd.f32 %v2094_v20, %v2084_v12  ;;  %v2083_v25 = vadd.f32 %v1954_v3, %v1904_v13  ;;  %v2085_v43 = vadd.f32 %v1995_v35, %v1906_v21 }
 0x1dc   : > { %v1956_v4 = vpop.f32.mrf.mxu0  ;;  %v1997_v45 = vpop.f32.mrf.mxu1 }
 0x1dd   : > { %2104 = vst [vmem:[%s2936_s29] sm:$0xff] %v2096_v14  ;;  %2106 = vst [vmem:[%s2936_s29 + $0x10] sm:$0xff] %v2098_v16  ;;  %v2097_v24 = vadd.f32 %v2094_v20, %v2083_v25  ;;  %v2099_v26 = vadd.f32 %v2094_v20, %v2085_v43 }
 0x1de   : > { %v1957_v46 = vpop.f32.mrf.mxu0  ;;  %v1998_v47 = vpop.f32.mrf.mxu1 }
 0x1df   : > { %2105 = vst [vmem:[%s2936_s29 + $0x8] sm:$0xff] %v2097_v24  ;;  %2107 = vst [vmem:[%s2936_s29 + $0x18] sm:$0xff] %v2099_v26 }
 0x1e0   : > { %v2034_v29 = vpop.f32.mrf.mxu0  ;;  %v2075_v28 = vpop.f32.mrf.mxu1 }
 0x1e1   : > { %v2086_v55 = vadd.f32 %v2034_v29, %v1907_v50  ;;  %v2088_v56 = vadd.f32 %v2075_v28, %v1909_v51 }
 0x1e2   : > { %v2036_v57 = vpop.f32.mrf.mxu0  ;;  %v2077_v0 = vpop.f32.mrf.mxu1 }
 0x1e3   : > { %v2100_v1 = vadd.f32 %v2094_v20, %v2086_v55  ;;  %v2102_v39 = vadd.f32 %v2094_v20, %v2088_v56  ;;  %v2087_v9 = vadd.f32 %v2036_v57, %v1908_v54  ;;  %v2089_v40 = vadd.f32 %v2077_v0, %v1910_v36 }
 0x1e4   : > { %v2038_v62 = vpop.f32.mrf.mxu0  ;;  %v2079_v63 = vpop.f32.mrf.mxu1 }
 0x1e5   : > { %2108 = vst [vmem:[%s2936_s29 + $0x20] sm:$0xff] %v2100_v1  ;;  %2110 = vst [vmem:[%s2936_s29 + $0x30] sm:$0xff] %v2102_v39  ;;  %v2101_v10 = vadd.f32 %v2094_v20, %v2087_v9  ;;  %v2103_v15 = vadd.f32 %v2094_v20, %v2089_v40 }
 0x1e6   : > { %v2039_v17 = vpop.f32.mrf.mxu0  ;;  %v2080_v22 = vpop.f32.mrf.mxu1 }
 0x1e7   : > { %2109 = vst [vmem:[%s2936_s29 + $0x28] sm:$0xff] %v2101_v10  ;;  %2111 = vst [vmem:[%s2936_s29 + $0x38] sm:$0xff] %v2103_v15 }
 0x1e8 PF: > { %s14_s19 = sadd.s32 1, %s2413_s19   ;;  %s2978_s15 = smov %s2405_s17 }
 0x1e9   : > { %p11_p9 = scmp.ge.s32.totalorder %s14_s19, 6   ;;  %s2979_s16 = smov %s2409_s18 }
 0x1ea   : > { %s2980_s17 = smov %s2983_s20  ;;  %s2981_s18 = smov %s2987_s21 }
 0x1eb   :  { %13 = sbr.rel (!%p11_p9) target bundleno = 3 (0x3), region = 77 }

</bundles_post_ra>
